<compile_context>
chip_gen: v7x
topology: tpu7x:2x2x1
jax: 0.10.0
libtpu: 0.0.40
codegen_flags: <defaults>
</compile_context>

<pallas_src>
import jax
import jax.numpy as jnp
from jax.experimental import pallas as pl
from jax.experimental.pallas import tpu as pltpu


def _round_up(x, m):
    return ((x + m - 1) // m) * m


def gcn_kernel(data_ref, adj_ref, d_ref, w1t_ref, b1_ref, w2t_ref, b2_ref,
               logp_ref):
    f32 = jnp.float32
    bf16 = jnp.bfloat16

    d = d_ref[...]                                   # (1, Np) f32, diag(D)^-1/2 (0 on padded nodes)
    adj = adj_ref[...]                               # (Np, Np) bf16

    # h = data @ (D^-1/2 A D^-1/2)  ==  ((data * d) @ A) * d   (diagonal D)
    x = (data_ref[...].astype(f32) * d).astype(bf16)
    h = jnp.dot(x, adj, preferred_element_type=f32) * d

    # h = ReLU(h @ W1^T + b1)
    h = jnp.dot(h.astype(bf16), w1t_ref[...], preferred_element_type=f32) + b1_ref[...]
    h = jnp.maximum(h, 0.0)

    # h = h @ (D^-1/2 A D^-1/2)
    h = jnp.dot((h * d).astype(bf16), adj, preferred_element_type=f32) * d

    # logits = h @ W2^T + b2   (padded class lanes carry bias -1e30 -> exp() == 0)
    logits = jnp.dot(h.astype(bf16), w2t_ref[...], preferred_element_type=f32) + b2_ref[...]

    # LogSoftmax over the class axis, kept in f32.
    m = jnp.max(logits, axis=-1, keepdims=True)
    z = logits - m
    lse = jnp.log(jnp.sum(jnp.exp(z), axis=-1, keepdims=True))
    logp_ref[...] = z - lse


def gcn_forward(data, adj, degree, w1, b1, w2, b2, y=None):
    """Mirrors GCNModel.forward. Returns logp (and per-sample NLL loss if y given)."""
    M, N = data.shape
    C = w2.shape[0]
    f32 = jnp.float32
    bf16 = jnp.bfloat16

    # ---- generation-aware knobs -------------------------------------------------
    kind = jax.devices()[0].device_kind.lower()
    is_v5 = "v5" in kind
    is_v7 = "v7" in kind
    try:
        vmem_capacity = int(pltpu.get_tpu_info().vmem_capacity_bytes)
    except Exception:
        vmem_capacity = (64 << 20) if is_v7 else (128 << 20)
    vmem_cap = int(vmem_capacity * 0.8)            # leave headroom for compiler scratch

    # Pad N (nodes / features) to a full-MXU-width multiple; pad classes to a lane.
    n_align = 128 if is_v5 else 256
    Np = _round_up(max(N, n_align), n_align)
    Cp = _round_up(max(C, 128), 128)

    # Row tile: up to 512 on v6e/v7x (256 on v5e), but keep >= 2 grid steps when M
    # allows so the "parallel" axis can shard across v7x's two TensorCores.
    if M <= 128:
        tm = max(8, _round_up(M, 8))
        Mp = tm
    else:
        tm_cap = 256 if is_v5 else 512
        tm = 128
        while tm * 2 <= tm_cap and tm * 2 <= M // 2:
            tm *= 2
        Mp = _round_up(M, tm)

    # ---- operand preparation ----------------------------------------------------
    # degree_matrix is diagonal in the GCN formulation, so
    # (degree.inverse()) ** 0.5 == diag(rsqrt(diag(degree))).
    # TODO(synk): a general dense matrix inverse has no Pallas primitive; only the
    # diagonal case (the one the reference model actually uses) is supported here.
    diag = jnp.diagonal(degree).astype(f32)
    d_vec = jnp.where(diag > 0, jax.lax.rsqrt(jnp.maximum(diag, 1e-30)), 0.0)
    d_p = jnp.zeros((1, Np), f32).at[0, :N].set(d_vec)

    data_p = jnp.zeros((Mp, Np), bf16).at[:M, :N].set(data.astype(bf16))
    adj_p = jnp.zeros((Np, Np), bf16).at[:N, :N].set(adj.astype(bf16))
    w1t_p = jnp.zeros((Np, Np), bf16).at[:N, :N].set(w1.T.astype(bf16))
    b1_p = jnp.zeros((1, Np), f32).at[0, :N].set(b1.astype(f32))
    w2t_p = jnp.zeros((Np, Cp), bf16).at[:N, :C].set(w2.T.astype(bf16))
    b2_p = jnp.full((1, Cp), -1e30, f32).at[0, :C].set(b2.astype(f32))

    # ---- VMEM budget ------------------------------------------------------------
    invariant_raw = 2 * Np * Np * 2 + Np * Cp * 2 + (2 * Np + Cp) * 4
    # Constant-index_map blocks are never re-fetched, so a second buffer is pure
    # waste; request single-buffering once the waste is non-trivial.
    single_buffer_invariants = invariant_raw >= (4 << 20)
    inv_mode = pl.Buffered(1) if single_buffer_invariants else None

    invariant_bytes = (1 if single_buffer_invariants else 2) * invariant_raw
    streamed_bytes = 2 * tm * Np * 2                # bf16 data tile, double-buffered
    out_bytes = 2 * tm * Cp * 4                     # f32 output tile, double-buffered
    scratch_bytes = 4 * tm * Np * 4 + (2 << 20)     # f32 intermediates + headroom
    vmem_needed = invariant_bytes + streamed_bytes + out_bytes + scratch_bytes

    if vmem_needed > vmem_cap:
        # TODO(synk): add a K-tiled / per-layer streaming path so adj and W1^T are
        # streamed instead of fully VMEM-resident (needed for N >~ 4k on v7x).
        raise NotImplementedError(
            f"resident operands need ~{vmem_needed >> 20} MiB VMEM but the budget is "
            f"{vmem_cap >> 20} MiB; streaming K-tiled path not implemented")
    vmem_bytes = int(max(8 << 20, min(vmem_needed, vmem_cap)))

    # ---- specs & call -----------------------------------------------------------
    def inv_spec(shape):
        if inv_mode is None:
            return pl.BlockSpec(shape, lambda i: (0, 0))
        return pl.BlockSpec(shape, lambda i: (0, 0), pipeline_mode=inv_mode)

    grid_spec = pltpu.PrefetchScalarGridSpec(
        num_scalar_prefetch=0,
        grid=(Mp // tm,),
        in_specs=[
            pl.BlockSpec((tm, Np), lambda i: (i, 0)),   # data row-tile (bf16, streamed)
            inv_spec((Np, Np)),                         # adj (bf16, resident)
            inv_spec((1, Np)),                          # d = diag(D)^-1/2
            inv_spec((Np, Np)),                         # W1^T (bf16, resident)
            inv_spec((1, Np)),                          # b1
            inv_spec((Np, Cp)),                         # W2^T padded (bf16, resident)
            inv_spec((1, Cp)),                          # b2 padded
        ],
        out_specs=pl.BlockSpec((tm, Cp), lambda i: (i, 0)),
    )

    flops = 6 * Mp * Np * Np + 2 * Mp * Np * Cp
    bytes_accessed = (Mp * Np * 2 + 2 * Np * Np * 2 + Np * Cp * 2
                      + (2 * Np + Cp) * 4 + Mp * Cp * 4)
    transcendentals = Mp * Cp + Mp

    logp_pad = pl.pallas_call(
        gcn_kernel,
        out_shape=jax.ShapeDtypeStruct((Mp, Cp), f32),
        grid_spec=grid_spec,
        compiler_params=pltpu.CompilerParams(
            dimension_semantics=("parallel",),
            vmem_limit_bytes=vmem_bytes),
        cost_estimate=pl.CostEstimate(
            flops=int(flops),
            transcendentals=int(transcendentals),
            bytes_accessed=int(bytes_accessed)),
    )(data_p, adj_p, d_p, w1t_p, b1_p, w2t_p, b2_p)

    logp = logp_pad[:M, :C]

    if y is not None:
        # NLLLoss(reduction='none'): tiny gather, done in the wrapper.
        loss = -jnp.take_along_axis(
            logp, y.reshape(M, 1).astype(jnp.int32), axis=1)[:, 0]
        return logp, loss
    return logp


if __name__ == "__main__":
    key = jax.random.PRNGKey(0)
    M, N, C = 8, 128, 16        # M samples, input_len = N nodes, out_length = C classes
    ks = jax.random.split(key, 8)

    data = jax.random.normal(ks[0], (M, N), jnp.float32)

    # Symmetric non-negative adjacency with self-loops; degree = diag(rowsum)
    a = jax.random.uniform(ks[1], (N, N), jnp.float32)
    adj = (a + a.T) * 0.5 + jnp.eye(N, dtype=jnp.float32)
    degree = jnp.diag(jnp.sum(adj, axis=1))

    # Deterministic Linear params (PyTorch-style uniform(-1/sqrt(fan_in), 1/sqrt(fan_in)))
    bound = 1.0 / jnp.sqrt(jnp.float32(N))
    w1 = jax.random.uniform(ks[2], (N, N), jnp.float32, -bound, bound)
    b1 = jax.random.uniform(ks[3], (N,), jnp.float32, -bound, bound)
    w2 = jax.random.uniform(ks[4], (C, N), jnp.float32, -bound, bound)
    b2 = jax.random.uniform(ks[5], (C,), jnp.float32, -bound, bound)

    y = jax.random.randint(ks[6], (M,), 0, C, jnp.int32)

    logp, loss = gcn_forward(data, adj, degree, w1, b1, w2, b2, y)
    jax.block_until_ready((logp, loss))

    assert logp.shape == (M, C) and loss.shape == (M,)
    assert bool(jnp.all(jnp.isfinite(logp))) and bool(jnp.all(jnp.isfinite(loss)))
    # LogSoftmax self-consistency: exp(logp) rows sum to 1.
    row_sums = jnp.sum(jnp.exp(logp), axis=-1)
    assert bool(jnp.allclose(row_sums, 1.0, atol=1e-3))
    print("KERNEL_OK")
</pallas_src>

<mosaic_0001>
module attributes {stable_mosaic.version = 11 : i64} {
  func.func @gcn_kernel(%arg0: i32, %arg1: memref<8x256xbf16, #tpu.memory_space<vmem>>, %arg2: memref<256x256xbf16, #tpu.memory_space<vmem>>, %arg3: memref<1x256xf32, #tpu.memory_space<vmem>>, %arg4: memref<256x256xbf16, #tpu.memory_space<vmem>>, %arg5: memref<1x256xf32, #tpu.memory_space<vmem>>, %arg6: memref<256x128xbf16, #tpu.memory_space<vmem>>, %arg7: memref<1x128xf32, #tpu.memory_space<vmem>>, %arg8: memref<8x128xf32, #tpu.memory_space<vmem>>) attributes {dimension_semantics = [#tpu.dimension_semantics<parallel>], iteration_bounds = array<i64: 1>, scalar_prefetch = 0 : i64, scratch_operands = 0 : i64, tpu.core_type = #tpu.core_type<tc>, window_params = [{transform_indices = @transform_0, window_bounds = array<i64: 8, 256>}, {pipeline_mode = #tpu.pipeline_mode<synchronous>, transform_indices = @transform_1, window_bounds = array<i64: 256, 256>}, {pipeline_mode = #tpu.pipeline_mode<synchronous>, transform_indices = @transform_2, window_bounds = array<i64: 1, 256>}, {pipeline_mode = #tpu.pipeline_mode<synchronous>, transform_indices = @transform_3, window_bounds = array<i64: 256, 256>}, {pipeline_mode = #tpu.pipeline_mode<synchronous>, transform_indices = @transform_4, window_bounds = array<i64: 1, 256>}, {pipeline_mode = #tpu.pipeline_mode<synchronous>, transform_indices = @transform_5, window_bounds = array<i64: 256, 128>}, {pipeline_mode = #tpu.pipeline_mode<synchronous>, transform_indices = @transform_6, window_bounds = array<i64: 1, 128>}, {transform_indices = @transform_7, window_bounds = array<i64: 8, 128>}]} {
    %c0 = arith.constant 0 : index
    %c0_0 = arith.constant 0 : index
    %0 = vector.load %arg3[%c0, %c0_0] : memref<1x256xf32, #tpu.memory_space<vmem>>, vector<1x256xf32>
    %c0_1 = arith.constant 0 : index
    %c0_2 = arith.constant 0 : index
    %1 = vector.load %arg2[%c0_1, %c0_2] : memref<256x256xbf16, #tpu.memory_space<vmem>>, vector<256x256xbf16>
    %c0_3 = arith.constant 0 : index
    %c0_4 = arith.constant 0 : index
    %2 = vector.load %arg1[%c0_3, %c0_4] : memref<8x256xbf16, #tpu.memory_space<vmem>>, vector<8x256xbf16>
    %3 = arith.extf %2 : vector<8x256xbf16> to vector<8x256xf32>
    %4 = vector.broadcast %0 : vector<1x256xf32> to vector<8x256xf32>
    %5 = arith.mulf %3, %4 : vector<8x256xf32>
    %6 = arith.truncf %5 : vector<8x256xf32> to vector<8x256xbf16>
    %cst = arith.constant dense<0.000000e+00> : vector<8x256xf32>
    %7 = tpu.matmul %6, %1, %cst {dimension_numbers = #tpu.dot_dimension_numbers<[1], [0], [0], [1], [0, 0, 1, 1], [], []>} : vector<8x256xbf16>, vector<256x256xbf16>, vector<8x256xf32> -> vector<8x256xf32>
    %8 = vector.broadcast %0 : vector<1x256xf32> to vector<8x256xf32>
    %9 = arith.mulf %7, %8 : vector<8x256xf32>
    %10 = arith.truncf %9 : vector<8x256xf32> to vector<8x256xbf16>
    %c0_5 = arith.constant 0 : index
    %c0_6 = arith.constant 0 : index
    %11 = vector.load %arg4[%c0_5, %c0_6] : memref<256x256xbf16, #tpu.memory_space<vmem>>, vector<256x256xbf16>
    %cst_7 = arith.constant dense<0.000000e+00> : vector<8x256xf32>
    %12 = tpu.matmul %10, %11, %cst_7 {dimension_numbers = #tpu.dot_dimension_numbers<[1], [0], [0], [1], [0, 0, 1, 1], [], []>} : vector<8x256xbf16>, vector<256x256xbf16>, vector<8x256xf32> -> vector<8x256xf32>
    %c0_8 = arith.constant 0 : index
    %c0_9 = arith.constant 0 : index
    %13 = vector.load %arg5[%c0_8, %c0_9] : memref<1x256xf32, #tpu.memory_space<vmem>>, vector<1x256xf32>
    %14 = vector.broadcast %13 : vector<1x256xf32> to vector<8x256xf32>
    %15 = arith.addf %12, %14 : vector<8x256xf32>
    %cst_10 = arith.constant 0.000000e+00 : f32
    %16 = vector.broadcast %cst_10 : f32 to vector<8x256xf32>
    %17 = arith.maximumf %15, %16 : vector<8x256xf32>
    %18 = vector.broadcast %0 : vector<1x256xf32> to vector<8x256xf32>
    %19 = arith.mulf %17, %18 : vector<8x256xf32>
    %20 = arith.truncf %19 : vector<8x256xf32> to vector<8x256xbf16>
    %cst_11 = arith.constant dense<0.000000e+00> : vector<8x256xf32>
    %21 = tpu.matmul %20, %1, %cst_11 {dimension_numbers = #tpu.dot_dimension_numbers<[1], [0], [0], [1], [0, 0, 1, 1], [], []>} : vector<8x256xbf16>, vector<256x256xbf16>, vector<8x256xf32> -> vector<8x256xf32>
    %22 = vector.broadcast %0 : vector<1x256xf32> to vector<8x256xf32>
    %23 = arith.mulf %21, %22 : vector<8x256xf32>
    %24 = arith.truncf %23 : vector<8x256xf32> to vector<8x256xbf16>
    %c0_12 = arith.constant 0 : index
    %c0_13 = arith.constant 0 : index
    %25 = vector.load %arg6[%c0_12, %c0_13] : memref<256x128xbf16, #tpu.memory_space<vmem>>, vector<256x128xbf16>
    %cst_14 = arith.constant dense<0.000000e+00> : vector<8x128xf32>
    %26 = tpu.matmul %24, %25, %cst_14 {dimension_numbers = #tpu.dot_dimension_numbers<[1], [0], [0], [1], [0, 0, 1, 1], [], []>} : vector<8x256xbf16>, vector<256x128xbf16>, vector<8x128xf32> -> vector<8x128xf32>
    %c0_15 = arith.constant 0 : index
    %c0_16 = arith.constant 0 : index
    %27 = vector.load %arg7[%c0_15, %c0_16] : memref<1x128xf32, #tpu.memory_space<vmem>>, vector<1x128xf32>
    %28 = vector.broadcast %27 : vector<1x128xf32> to vector<8x128xf32>
    %29 = arith.addf %26, %28 : vector<8x128xf32>
    %cst_17 = arith.constant dense<0xFF800000> : vector<8xf32>
    %30 = vector.multi_reduction <maximumf>, %29, %cst_17 [1] : vector<8x128xf32> to vector<8xf32>
    %31 = vector.shape_cast %30 : vector<8xf32> to vector<8x1xf32>
    %32 = vector.broadcast %31 : vector<8x1xf32> to vector<8x128xf32>
    %33 = arith.subf %29, %32 : vector<8x128xf32>
    %34 = math.exp %33 : vector<8x128xf32>
    %cst_18 = arith.constant dense<0.000000e+00> : vector<8xf32>
    %35 = vector.multi_reduction <add>, %34, %cst_18 [1] : vector<8x128xf32> to vector<8xf32>
    %36 = vector.shape_cast %35 : vector<8xf32> to vector<8x1xf32>
    %37 = math.log %36 : vector<8x1xf32>
    %38 = vector.broadcast %37 : vector<8x1xf32> to vector<8x128xf32>
    %39 = arith.subf %33, %38 : vector<8x128xf32>
    %c0_19 = arith.constant 0 : index
    %c0_20 = arith.constant 0 : index
    %40 = vector.load %arg8[%c0_19, %c0_20] : memref<8x128xf32, #tpu.memory_space<vmem>>, vector<8x128xf32>
    tpu.vector_store %arg8[%c0_19, %c0_20], %39 {strides = array<i32>} : memref<8x128xf32, #tpu.memory_space<vmem>>, vector<8x128xf32>,
    return
  }
  func.func @transform_0(%arg0: i32) -> (i32, i32) {
    %c0_i32 = arith.constant 0 : i32
    %c0_i32_0 = arith.constant 0 : i32
    return %arg0, %c0_i32 : i32, i32
  }
  func.func @transform_1(%arg0: i32) -> (i32, i32) {
    %c0_i32 = arith.constant 0 : i32
    %c0_i32_0 = arith.constant 0 : i32
    %c0_i32_1 = arith.constant 0 : i32
    return %c0_i32, %c0_i32_0 : i32, i32
  }
  func.func @transform_2(%arg0: i32) -> (i32, i32) {
    %c0_i32 = arith.constant 0 : i32
    %c0_i32_0 = arith.constant 0 : i32
    %c0_i32_1 = arith.constant 0 : i32
    return %c0_i32, %c0_i32_0 : i32, i32
  }
  func.func @transform_3(%arg0: i32) -> (i32, i32) {
    %c0_i32 = arith.constant 0 : i32
    %c0_i32_0 = arith.constant 0 : i32
    %c0_i32_1 = arith.constant 0 : i32
    return %c0_i32, %c0_i32_0 : i32, i32
  }
  func.func @transform_4(%arg0: i32) -> (i32, i32) {
    %c0_i32 = arith.constant 0 : i32
    %c0_i32_0 = arith.constant 0 : i32
    %c0_i32_1 = arith.constant 0 : i32
    return %c0_i32, %c0_i32_0 : i32, i32
  }
  func.func @transform_5(%arg0: i32) -> (i32, i32) {
    %c0_i32 = arith.constant 0 : i32
    %c0_i32_0 = arith.constant 0 : i32
    %c0_i32_1 = arith.constant 0 : i32
    return %c0_i32, %c0_i32_0 : i32, i32
  }
  func.func @transform_6(%arg0: i32) -> (i32, i32) {
    %c0_i32 = arith.constant 0 : i32
    %c0_i32_0 = arith.constant 0 : i32
    %c0_i32_1 = arith.constant 0 : i32
    return %c0_i32, %c0_i32_0 : i32, i32
  }
  func.func @transform_7(%arg0: i32) -> (i32, i32) {
    %c0_i32 = arith.constant 0 : i32
    %c0_i32_0 = arith.constant 0 : i32
    return %arg0, %c0_i32 : i32, i32
  }
}

</mosaic_0001>

<bundles_post_ra>
// kernel: tpu_custom_call.1
= control target key start
LH: loop header
LB: loop body
LE: loop exit
PB: predicated region body
PF: predicated region fallthrough
CT: control target
= control target key end

     0   :  { %12 = vsyncpa [#allocation3], 0  ;;  %s1454_s0 = inlined_call_operand.hbm [shape: bf16[8,256], index: 0, kind: input, shape index: {}]   ;;  %s1455_s1 = inlined_call_operand.hbm [shape: bf16[256,256], index: 1, kind: input, shape index: {}]   ;;  %s1456_s2 = inlined_call_operand.vmem [shape: f32[1,256], index: 2, kind: input, shape index: {}]   ;;  %s1457_s3 = inlined_call_operand.hbm [shape: bf16[256,256], index: 3, kind: input, shape index: {}]   ;;  %s1458_s4 = inlined_call_operand.vmem [shape: f32[1,256], index: 4, kind: input, shape index: {}]   ;;  %s1459_s5 = inlined_call_operand.hbm [shape: bf16[256,128], index: 5, kind: input, shape index: {}]   ;;  %s1460_s6 = inlined_call_operand.vmem [shape: f32[1,128], index: 6, kind: input, shape index: {}]   ;;  %s1461_s7 = inlined_call_operand.hbm [shape: f32[8,128], index: 7, kind: output, shape index: {}]  }
   0x1   :  { %13 = vsyncpa [#allocation6], 0 }
   0x2   :  { %14 = vsyncpa [#allocation9], 0 }
   0x3   :  { %15 = vsyncpa [#allocation4], 0  ;;  %s1182_s24 = smov [#allocation5]   ;;  %s1064_s28 = scalar_lea.hbm %s1455_s1, 4096 }
   0x4   :  { %s31_s25 = sshll.u32 %s1182_s24, 4  ;;  %p1065_p0 = scmp.ne.s32.totalorder %s1455_s1, %s1064_s28  ;;  %s32_s25 = int_to_ptr.vmem [resolvable:$true] %s31_s25 }
   0x5   :  { %p1068_p1 = scmp.lt.u32.totalorder %s1064_s28, %s1455_s1 }
   0x7   :  { %p1070_p2 = pnand %p1068_p1, %p1065_p0 }
   0x9   :  { %1073 = shalt.err (!%p1070_p2)
}
   0xa   :  { %s1074_s10 = scalar_lea.vmem %s32_s25, 4096  ;;  %p1079_p4 = scmp.lt.s32.totalorder %s32_s25, %s32_s25 }
   0xb   :  { %p1075_p3 = scmp.ne.s32.totalorder %s32_s25, %s1074_s10  ;;  %p1080_p5 = scmp.lt.s32.totalorder %s1074_s10, %s1074_s10 }
   0xd   :  { %p1081_p6 = por %p1080_p5, %p1079_p4 }
   0xf   :  { %p1082_p7 = pnand %p1081_p6, %p1075_p3 }
  0x11   :  { %1085 = shalt.err (!%p1082_p7)
}
  0x12   :  { %s1183_s11 = smov 128   ;;  %s1184_s12 = smov 8  }
  0x13   :  { %37 = dma.hbm_to_vmem [thread:$0]  %s1455_s1, 4096, %s32_s25, [#allocation6], %s1183_s11, %s1183_s11, %s1184_s12  }
  0x14   :  { %s1185_s15 = smov [#allocation2]   ;;  %s1186_s17 = smov [#allocation7]  }
  0x15   :  { %s22_s16 = sshll.u32 %s1185_s15, 4  ;;  %s45_s18 = sshll.u32 %s1186_s17, 4  ;;  %s23_s16 = int_to_ptr.vmem [resolvable:$true] %s22_s16  ;;  %s46_s18 = int_to_ptr.vmem [resolvable:$true] %s45_s18 }
  0x16   :  { %s1086_s21 = scalar_lea.hbm %s1454_s0, 128 }
  0x17   :  { %p1087_p8 = scmp.ne.s32.totalorder %s1454_s0, %s1086_s21  ;;  %p1090_p9 = scmp.lt.u32.totalorder %s1086_s21, %s1454_s0 }
  0x19   :  { %p1092_p10 = pnand %p1090_p9, %p1087_p8 }
  0x1b   :  { %1095 = shalt.err (!%p1092_p10)
}
  0x1c   :  { %s1096_s1 = scalar_lea.vmem %s23_s16, 128  ;;  %p1101_p12 = scmp.lt.s32.totalorder %s23_s16, %s23_s16 }
  0x1d   :  { %p1097_p11 = scmp.ne.s32.totalorder %s23_s16, %s1096_s1  ;;  %p1102_p13 = scmp.lt.s32.totalorder %s1096_s1, %s1096_s1 }
  0x1f   :  { %p1103_p0 = por %p1102_p13, %p1101_p12 }
  0x21   :  { %p1104_p1 = pnand %p1103_p0, %p1097_p11 }
  0x23   :  { %1107 = shalt.err (!%p1104_p1)
}
  0x24   :  { %25 = dma.hbm_to_vmem [thread:$0]  %s1454_s0, 128, %s23_s16, [#allocation3]  }
  0x25   :  { %s1108_s30 = scalar_lea.hbm %s1457_s3, 4096 }
  0x26   :  { %p1109_p2 = scmp.ne.s32.totalorder %s1457_s3, %s1108_s30  ;;  %p1112_p3 = scmp.lt.u32.totalorder %s1108_s30, %s1457_s3 }
  0x28   :  { %p1114_p4 = pnand %p1112_p3, %p1109_p2 }
  0x2a   :  { %1117 = shalt.err (!%p1114_p4)
}
  0x2b   :  { %s1118_s14 = scalar_lea.vmem %s46_s18, 4096  ;;  %p1123_p6 = scmp.lt.s32.totalorder %s46_s18, %s46_s18 }
  0x2c   :  { %p1119_p5 = scmp.ne.s32.totalorder %s46_s18, %s1118_s14  ;;  %p1124_p7 = scmp.lt.s32.totalorder %s1118_s14, %s1118_s14 }
  0x2e   :  { %p1125_p8 = por %p1124_p7, %p1123_p6 }
  0x30   :  { %p1126_p9 = pnand %p1125_p8, %p1119_p5 }
  0x32   :  { %1129 = shalt.err (!%p1126_p9)
}
  0x33   :  { %51 = dma.hbm_to_vmem [thread:$0]  %s1457_s3, 4096, %s46_s18, [#allocation6], %s1183_s11, %s1183_s11, %s1184_s12  }
  0x34   :  { %s1187_s16 = smov [#allocation8]   ;;  %s1130_s21 = scalar_lea.hbm %s1459_s5, 2048 }
  0x35   :  { %s59_s17 = sshll.u32 %s1187_s16, 4  ;;  %p1131_p10 = scmp.ne.s32.totalorder %s1459_s5, %s1130_s21  ;;  %s60_s17 = int_to_ptr.vmem [resolvable:$true] %s59_s17 }
  0x36   :  { %p1134_p11 = scmp.lt.u32.totalorder %s1130_s21, %s1459_s5 }
  0x38   :  { %p1136_p12 = pnand %p1134_p11, %p1131_p10 }
  0x3a   :  { %1139 = shalt.err (!%p1136_p12)
}
  0x3b   :  { %s1140_s1 = scalar_lea.vmem %s60_s17, 2048  ;;  %p1145_p0 = scmp.lt.s32.totalorder %s60_s17, %s60_s17 }
  0x3c   :  { %p1141_p13 = scmp.ne.s32.totalorder %s60_s17, %s1140_s1  ;;  %p1146_p1 = scmp.lt.s32.totalorder %s1140_s1, %s1140_s1 }
  0x3e   :  { %p1147_p2 = por %p1146_p1, %p1145_p0 }
  0x40   :  { %p1148_p3 = pnand %p1147_p2, %p1141_p13 }
  0x42   :  { %1151 = shalt.err (!%p1148_p3)
}
  0x43   :  { %s1188_s3 = smov 64   ;;  %s1189_s11 = smov 4  }
  0x44   :  { %65 = dma.hbm_to_vmem [thread:$0]  %s1459_s5, 2048, %s60_s17, [#allocation9], %s1188_s3, %s1188_s3, %s1189_s11  }
  0x45   :  { %1174 = dma.done.wait [#allocation3], 128  }
  0x46   :  { %1175 = vsyncadd [#allocation3], 4294967168 }
  0x47   :  { %1176 = dma.done.wait [#allocation6], 8192  }
  0x48   :  { %1177 = vsyncadd [#allocation6], 4294959104 }
  0x49   :  { %1178 = dma.done.wait [#allocation9], 2048  }
  0x4a   :  { %1179 = vsyncadd [#allocation9], 4294965248  ;;  %v1285_v0 = vld [vmem:[#allocation5 + $0x4] ss:$8 sps:$4 sm:$0xff]   ;;  %v1287_v1 = vld [vmem:[#allocation5] ss:$8 sps:$4 sm:$0xff]   ;;  %v118_v7 = vlaneseq }
  0x4b   :  { %292 = vmatprep.subr.bf16.mxu0 %v1285_v0  ;;  %v1290_v2 = vld [vmem:[#allocation5 + $0x14] ss:$8 sps:$4 sm:$0xff]   ;;  %v1293_v3 = vld [vmem:[#allocation5 + $0x10] ss:$8 sps:$4 sm:$0xff]   ;;  %v1296_v4 = vld [vmem:[#allocation5 + $0x24] ss:$8 sps:$4 sm:$0xff]  }
  0x4c   :  { %293 = vmatpush1.bf16.msra.mxu0 %v1287_v1  ;;  %v1299_v5 = vld [vmem:[#allocation5 + $0x20] ss:$8 sps:$4 sm:$0xff]   ;;  %v1302_v6 = vld [vmem:[#allocation5 + $0x34] ss:$8 sps:$4 sm:$0xff]   ;;  %v1305_v8 = vld [vmem:[#allocation5 + $0x30] ss:$8 sps:$4 sm:$0xff]  }
  0x4d   :  { %294 = vmatprep.subr.bf16.mxu0 %v1290_v2  ;;  %v1308_v9 = vld [vmem:[#allocation5 + $0x44] ss:$8 sps:$4 sm:$0xff]   ;;  %v1310_v10 = vshrl.u32 %v118_v7, 7  ;;  %v1313_v11 = vld [vmem:[#allocation5 + $0x40] ss:$8 sps:$4 sm:$0xff]   ;;  %v1332_v18 = vld [vmem:[#allocation2] sm:$0xff] }
  0x4e   :  { %v1316_v12 = vld [vmem:[#allocation5 + $0x54] ss:$8 sps:$4 sm:$0xff]   ;;  %v1320_v14 = vld [vmem:[#allocation5 + $0x50] ss:$8 sps:$4 sm:$0xff]   ;;  %v1323_v15 = vld [vmem:[#allocation5 + $0x64] ss:$8 sps:$4 sm:$0xff]   ;;  %v116_v19 = vunpack.c.h.bf16 %v1332_v18  ;;  %v115_v57 = vunpack.c.l.bf16 %v1332_v18 }
  0x4f   :  { %v124_v13 = vsub.s32 1, %v1310_v10  ;;  %v1325_v16 = vld [vmem:[#allocation5 + $0x60] ss:$8 sps:$4 sm:$0xff]   ;;  %v1330_v17 = vld [vmem:[%s1456_s2] sm:$0x3]  ;;  %v120_v47 = vsub.s32 0, %v1310_v10 }
  0x50   :  { %295 = vmatpush1.bf16.msra.mxu0 %v1293_v3  ;;  %v996_v21 = vld [vmem:[#allocation7 + $0x4] ss:$8 sps:$4 sm:$0xff]   ;;  %v998_v22 = vld [vmem:[#allocation7] ss:$8 sps:$4 sm:$0xff]   ;;  %v1342_v23 = vld [vmem:[#allocation5 + $0x74] ss:$8 sps:$4 sm:$0xff]  }
  0x51   :  { %296 = vmatprep.subr.bf16.mxu0 %v1296_v4  ;;  %v1338_v20 = vrot.slane %v1330_v17, %v124_v13  ;;  %541 = vmatprep.subr.bf16.mxu1 %v996_v21  ;;  %v999_v25 = vld [vmem:[#allocation7 + $0x14] ss:$8 sps:$4 sm:$0xff]   ;;  %v1001_v26 = vld [vmem:[#allocation7 + $0x10] ss:$8 sps:$4 sm:$0xff]   ;;  %v1002_v28 = vld [vmem:[#allocation7 + $0x24] ss:$8 sps:$4 sm:$0xff]   ;;  %v1392_v58 = vrot.slane %v1330_v17, %v120_v47 }
  0x52   :  { %542 = vmatpush1.bf16.msra.mxu1 %v998_v22  ;;  %v1346_v29 = vld [vmem:[#allocation5 + $0x70] ss:$8 sps:$4 sm:$0xff]   ;;  %v1349_v30 = vld [vmem:[#allocation5 + $0x84] ss:$8 sps:$4 sm:$0xff]   ;;  %v1004_v31 = vld [vmem:[#allocation7 + $0x20] ss:$8 sps:$4 sm:$0xff]  }
  0x53   :  { %v129_v24 = vmul.f32 %v1338_v20, %v116_v19  ;;  %543 = vmatprep.subr.bf16.mxu1 %v999_v25  ;;  %v1005_v32 = vld [vmem:[#allocation7 + $0x34] ss:$8 sps:$4 sm:$0xff]   ;;  %v1352_v33 = vld [vmem:[#allocation5 + $0x80] ss:$8 sps:$4 sm:$0xff]   ;;  %v1007_v35 = vld [vmem:[#allocation7 + $0x30] ss:$8 sps:$4 sm:$0xff]   ;;  %v128_v63 = vmul.f32 %v1392_v58, %v115_v57 }
  0x54   :  { %297 = vmatpush1.bf16.msra.mxu0 %v1299_v5  ;;  %v1355_v34 = vld [vmem:[#allocation5 + $0x94] ss:$8 sps:$4 sm:$0xff]   ;;  %v1008_v36 = vld [vmem:[#allocation7 + $0x44] ss:$8 sps:$4 sm:$0xff]   ;;  %v1358_v37 = vld [vmem:[#allocation5 + $0x90] ss:$8 sps:$4 sm:$0xff]  }
  0x55   :  { %298 = vmatprep.subr.bf16.mxu0 %v1302_v6  ;;  %v131_v27 = vpack.c.bf16 %v129_v24, %v129_v24  ;;  %v1361_v38 = vld [vmem:[#allocation5 + $0xa4] ss:$8 sps:$4 sm:$0xff]   ;;  %v1010_v39 = vld [vmem:[#allocation7 + $0x40] ss:$8 sps:$4 sm:$0xff]   ;;  %v1011_v40 = vld [vmem:[#allocation7 + $0x54] ss:$8 sps:$4 sm:$0xff]   ;;  %v130_v19 = vpack.c.bf16 %v128_v63, %v128_v63 }
  0x56   :  { %544 = vmatpush1.bf16.msra.mxu1 %v1001_v26  ;;  %v1364_v41 = vld [vmem:[#allocation5 + $0xa0] ss:$8 sps:$4 sm:$0xff]   ;;  %v1367_v42 = vld [vmem:[#allocation5 + $0xb4] ss:$8 sps:$4 sm:$0xff]   ;;  %v1013_v43 = vld [vmem:[#allocation7 + $0x50] ss:$8 sps:$4 sm:$0xff]  }
  0x57   :  { %324 = vmatprep.mubr.bf16.mxu0 %v131_v27  ;;  %545 = vmatprep.subr.bf16.mxu1 %v1002_v28  ;;  %v1369_v44 = vld [vmem:[#allocation5 + $0xb0] ss:$8 sps:$4 sm:$0xff]   ;;  %v1014_v45 = vld [vmem:[#allocation7 + $0x64] ss:$8 sps:$4 sm:$0xff]   ;;  %v1016_v48 = vld [vmem:[#allocation7 + $0x60] ss:$8 sps:$4 sm:$0xff]  }
  0x58   :  { %299 = vmatpush1.bf16.msra.mxu0 %v1305_v8  ;;  %v1371_v46 = vld [vmem:[#allocation5 + $0xc4] ss:$8 sps:$4 sm:$0xff]   ;;  %v1017_v49 = vld [vmem:[#allocation7 + $0x74] ss:$8 sps:$4 sm:$0xff]   ;;  %v1376_v50 = vld [vmem:[#allocation5 + $0xc0] ss:$8 sps:$4 sm:$0xff]  }
  0x59   :  { %300 = vmatprep.subr.bf16.mxu0 %v1308_v9  ;;  %v1378_v51 = vld [vmem:[#allocation5 + $0xd4] ss:$8 sps:$4 sm:$0xff]   ;;  %v1019_v52 = vld [vmem:[#allocation7 + $0x70] ss:$8 sps:$4 sm:$0xff]   ;;  %v1020_v53 = vld [vmem:[#allocation7 + $0x84] ss:$8 sps:$4 sm:$0xff]  }
  0x5a   :  { %546 = vmatpush1.bf16.msra.mxu1 %v1004_v31  ;;  %v1382_v54 = vld [vmem:[#allocation5 + $0xd0] ss:$8 sps:$4 sm:$0xff]   ;;  %v1384_v55 = vld [vmem:[#allocation5 + $0xe4] ss:$8 sps:$4 sm:$0xff]   ;;  %v1022_v56 = vld [vmem:[#allocation7 + $0x80] ss:$8 sps:$4 sm:$0xff]  }
  0x5b   :  { %547 = vmatprep.subr.bf16.mxu1 %v1005_v32  ;;  %v1023_v59 = vld [vmem:[#allocation7 + $0x94] ss:$8 sps:$4 sm:$0xff]   ;;  %v992_v60 = vld [vmem:[#allocation5 + $0xe0] ss:$8 sps:$4 sm:$0xff]   ;;  %v1025_v62 = vld [vmem:[#allocation7 + $0x90] ss:$8 sps:$4 sm:$0xff]  }
  0x5c   :  { %301 = vmatpush1.bf16.msra.mxu0 %v1313_v11  ;;  %v993_v61 = vld [vmem:[#allocation5 + $0xf4] ss:$8 sps:$4 sm:$0xff]   ;;  %v1026_v7 = vld [vmem:[#allocation7 + $0xa4] ss:$8 sps:$4 sm:$0xff]   ;;  %v995_v18 = vld [vmem:[#allocation5 + $0xf0] ss:$8 sps:$4 sm:$0xff]  }
  0x5d   :  { %302 = vmatprep.subr.bf16.mxu0 %v1316_v12  ;;  %v1028_v17 = vld [vmem:[#allocation7 + $0xa0] ss:$8 sps:$4 sm:$0xff]   ;;  %v1029_v21 = vld [vmem:[#allocation7 + $0xb4] ss:$8 sps:$4 sm:$0xff]   ;;  %v1031_v22 = vld [vmem:[#allocation7 + $0xb0] ss:$8 sps:$4 sm:$0xff]  }
  0x5e   :  { %548 = vmatpush1.bf16.msra.mxu1 %v1007_v35  ;;  %v1032_v24 = vld [vmem:[#allocation7 + $0xc4] ss:$8 sps:$4 sm:$0xff]   ;;  %v1034_v25 = vld [vmem:[#allocation7 + $0xc0] ss:$8 sps:$4 sm:$0xff]   ;;  %v1035_v26 = vld [vmem:[#allocation7 + $0xd4] ss:$8 sps:$4 sm:$0xff]  }
  0x5f   :  { %549 = vmatprep.subr.bf16.mxu1 %v1008_v36  ;;  %v1037_v27 = vld [vmem:[#allocation7 + $0xd0] ss:$8 sps:$4 sm:$0xff]   ;;  %v1047_v28 = vld [vmem:[#allocation8 + $0x8] sm:$0xff]   ;;  %s1190_s29 = smov [#allocation10]  }
  0x60   :  { %303 = vmatpush1.bf16.msra.mxu0 %v1320_v14  ;;  %v1050_v31 = vld [vmem:[#allocation8 + $0x58] sm:$0xff]   ;;  %v1054_v35 = vld [vmem:[#allocation8 + $0x68] sm:$0xff]   ;;  %s825_s30 = sshll.u32 %s1190_s29, 4  ;;  %s826_s30 = int_to_ptr.vmem [resolvable:$true] %s825_s30 }
  0x61   :  { %304 = vmatprep.subr.bf16.mxu0 %v1323_v15  ;;  %v1051_v32 = vld [vmem:[#allocation8 + $0x18] sm:$0xff]   ;;  %v1055_v36 = vld [vmem:[#allocation8 + $0x28] sm:$0xff]   ;;  %p1157_p5 = scmp.lt.s32.totalorder %s826_s30, %s826_s30 }
  0x62   :  { %550 = vmatpush1.bf16.msra.mxu1 %v1010_v39  ;;  %v1058_v10 = vld [vmem:[#allocation8 + $0x78] sm:$0xff]  }
  0x63   :  { %551 = vmatprep.subr.bf16.mxu1 %v1011_v40 }
  0x64   :  { %305 = vmatpush1.bf16.msra.mxu0 %v1325_v16 }
  0x65   :  { %306 = vmatprep.subr.bf16.mxu0 %v1342_v23 }
  0x66   :  { %552 = vmatpush1.bf16.msra.mxu1 %v1013_v43 }
  0x67   :  { %553 = vmatprep.subr.bf16.mxu1 %v1014_v45 }
  0x68   :  { %307 = vmatpush1.bf16.msra.mxu0 %v1346_v29 }
  0x69   :  { %308 = vmatprep.subr.bf16.mxu0 %v1349_v30 }
  0x6a   :  { %554 = vmatpush1.bf16.msra.mxu1 %v1016_v48 }
  0x6b   :  { %555 = vmatprep.subr.bf16.mxu1 %v1017_v49 }
  0x6c   :  { %309 = vmatpush1.bf16.msra.mxu0 %v1352_v33 }
  0x6d   :  { %310 = vmatprep.subr.bf16.mxu0 %v1355_v34 }
  0x6e   :  { %556 = vmatpush1.bf16.msra.mxu1 %v1019_v52 }
  0x6f   :  { %557 = vmatprep.subr.bf16.mxu1 %v1020_v53 }
  0x70   :  { %311 = vmatpush1.bf16.msra.mxu0 %v1358_v37 }
  0x71   :  { %312 = vmatprep.subr.bf16.mxu0 %v1361_v38 }
  0x72   :  { %558 = vmatpush1.bf16.msra.mxu1 %v1022_v56 }
  0x73   :  { %559 = vmatprep.subr.bf16.mxu1 %v1023_v59 }
  0x74   :  { %313 = vmatpush1.bf16.msra.mxu0 %v1364_v41 }
  0x75   :  { %314 = vmatprep.subr.bf16.mxu0 %v1367_v42 }
  0x76   :  { %560 = vmatpush1.bf16.msra.mxu1 %v1025_v62 }
  0x77   :  { %561 = vmatprep.subr.bf16.mxu1 %v1026_v7 }
  0x78   :  { %315 = vmatpush1.bf16.msra.mxu0 %v1369_v44 }
  0x79   :  { %316 = vmatprep.subr.bf16.mxu0 %v1371_v46 }
  0x7a   :  { %562 = vmatpush1.bf16.msra.mxu1 %v1028_v17 }
  0x7b   :  { %563 = vmatprep.subr.bf16.mxu1 %v1029_v21 }
  0x7c   :  { %317 = vmatpush1.bf16.msra.mxu0 %v1376_v50 }
  0x7d   :  { %318 = vmatprep.subr.bf16.mxu0 %v1378_v51 }
  0x7e   :  { %564 = vmatpush1.bf16.msra.mxu1 %v1031_v22 }
  0x7f   :  { %565 = vmatprep.subr.bf16.mxu1 %v1032_v24 }
  0x80   :  { %319 = vmatpush1.bf16.msra.mxu0 %v1382_v54 }
  0x81   :  { %320 = vmatprep.subr.bf16.mxu0 %v1384_v55 }
  0x82   :  { %566 = vmatpush1.bf16.msra.mxu1 %v1034_v25 }
  0x83   :  { %567 = vmatprep.subr.bf16.mxu1 %v1035_v26 }
  0x84   :  { %321 = vmatpush1.bf16.msra.mxu0 %v992_v60 }
  0x85   :  { %322 = vmatprep.subr.bf16.mxu0 %v993_v61 }
  0x86   :  { %568 = vmatpush1.bf16.msra.mxu1 %v1037_v27 }
  0x88   :  { %323 = vmatpush1.bf16.msra.mxu0 %v995_v18 }
  0x89   :  { %588 = vmatprep.subr.bf16.mxu0 %v1285_v0  ;;  %v1038_v0 = vld [vmem:[#allocation7 + $0xe4] ss:$8 sps:$4 sm:$0xff]  }
  0x8a   :  { %569 = vmatprep.subr.bf16.mxu1 %v1038_v0 }
  0x8b   :  { %325 = vmatmul.mubr.bf16.vlgmr.msra.gmra.mrb[0].mxu0 %v130_v19 }
  0x8c   :  { %589 = vmatpush1.bf16.msra.mxu0 %v1287_v1  ;;  %v1040_v1 = vld [vmem:[#allocation7 + $0xe0] ss:$8 sps:$4 sm:$0xff]  }
  0x8d   :  { %590 = vmatprep.subr.bf16.mxu0 %v1290_v2  ;;  %570 = vmatpush1.bf16.msra.mxu1 %v1040_v1  ;;  %v1041_v2 = vld [vmem:[#allocation7 + $0xf4] ss:$8 sps:$4 sm:$0xff]  }
  0x8e   :  { %571 = vmatprep.subr.bf16.mxu1 %v1041_v2 }
  0x90   :  { %591 = vmatpush1.bf16.msra.mxu0 %v1293_v3  ;;  %v1043_v3 = vld [vmem:[#allocation7 + $0xf0] ss:$8 sps:$4 sm:$0xff]  }
  0x91   :  { %592 = vmatprep.subr.bf16.mxu0 %v1296_v4  ;;  %572 = vmatpush1.bf16.msra.mxu1 %v1043_v3 }
  0x94   :  { %593 = vmatpush1.bf16.msra.mxu0 %v1299_v5 }
  0x95   :  { %594 = vmatprep.subr.bf16.mxu0 %v1302_v6 }
  0x98   :  { %595 = vmatpush1.bf16.msra.mxu0 %v1305_v8 }
  0x99   :  { %596 = vmatprep.subr.bf16.mxu0 %v1308_v9 }
  0x9c   :  { %597 = vmatpush1.bf16.msra.mxu0 %v1313_v11 }
  0x9d   :  { %598 = vmatprep.subr.bf16.mxu0 %v1316_v12 }
  0xa0   :  { %599 = vmatpush1.bf16.msra.mxu0 %v1320_v14 }
  0xa1   :  { %600 = vmatprep.subr.bf16.mxu0 %v1323_v15  ;;  %v1044_v15 = vld [vmem:[#allocation8 + $0x40] sm:$0xff]  }
  0xa2   :  { %917 = vmatprep.subr.bf16.mxu1 %v1044_v15 }
  0xa4   :  { %601 = vmatpush1.bf16.msra.mxu0 %v1325_v16  ;;  %v1045_v16 = vld [vmem:[#allocation8] sm:$0xff]  }
  0xa5   :  { %602 = vmatprep.subr.bf16.mxu0 %v1342_v23  ;;  %v1046_v23 = vld [vmem:[#allocation8 + $0x48] sm:$0xff]  }
  0xa8   :  { %603 = vmatpush1.bf16.msra.mxu0 %v1346_v29  ;;  %v1048_v29 = vld [vmem:[#allocation8 + $0x50] sm:$0xff]  }
  0xa9   :  { %604 = vmatprep.subr.bf16.mxu0 %v1349_v30  ;;  %v1049_v30 = vld [vmem:[#allocation8 + $0x10] sm:$0xff]  }
  0xac   :  { %605 = vmatpush1.bf16.msra.mxu0 %v1352_v33  ;;  %v1052_v33 = vld [vmem:[#allocation8 + $0x60] sm:$0xff]  }
  0xad   :  { %606 = vmatprep.subr.bf16.mxu0 %v1355_v34  ;;  %v1053_v34 = vld [vmem:[#allocation8 + $0x20] sm:$0xff]  }
  0xb0   :  { %607 = vmatpush1.bf16.msra.mxu0 %v1358_v37  ;;  %v1056_v37 = vld [vmem:[#allocation8 + $0x70] sm:$0xff]  }
  0xb1   :  { %608 = vmatprep.subr.bf16.mxu0 %v1361_v38  ;;  %v369_v38 = vld [vmem:[%s1458_s4] sm:$0x3] }
  0xb2   :  { %v374_v39 = vrot.slane %v369_v38, %v120_v47  ;;  %v378_v40 = vrot.slane %v369_v38, %v124_v13  ;;  %v1057_v47 = vld [vmem:[#allocation8 + $0x30] sm:$0xff]   ;;  %v1059_v13 = vld [vmem:[#allocation8 + $0x38] sm:$0xff]  }
  0xb4   :  { %609 = vmatpush1.bf16.msra.mxu0 %v1364_v41 }
  0xb5   :  { %610 = vmatprep.subr.bf16.mxu0 %v1367_v42 }
  0xb8   :  { %611 = vmatpush1.bf16.msra.mxu0 %v1369_v44 }
  0xb9   :  { %612 = vmatprep.subr.bf16.mxu0 %v1371_v46 }
  0xbc   :  { %613 = vmatpush1.bf16.msra.mxu0 %v1376_v50 }
  0xbd   :  { %614 = vmatprep.subr.bf16.mxu0 %v1378_v51 }
  0xc0   :  { %615 = vmatpush1.bf16.msra.mxu0 %v1382_v54 }
  0xc1   :  { %616 = vmatprep.subr.bf16.mxu0 %v1384_v55 }
  0xc4   :  { %617 = vmatpush1.bf16.msra.mxu0 %v992_v60 }
  0xc5   :  { %618 = vmatprep.subr.bf16.mxu0 %v993_v61 }
  0xc8   :  { %619 = vmatpush1.bf16.msra.mxu0 %v995_v18  ;;  %v900_v18 = vld [vmem:[%s1460_s6] ss:$0 sm:$0xff]  ;;  %s1152_s6 = scalar_lea.vmem %s826_s30, 128 }
  0xc9   :  { %p1153_p4 = scmp.ne.s32.totalorder %s826_s30, %s1152_s6  ;;  %p1158_p6 = scmp.lt.s32.totalorder %s1152_s6, %s1152_s6 }
  0xcb   :  { %p1159_p7 = por %p1158_p6, %p1157_p5 }
  0xcd   :  { %p1160_p8 = pnand %p1159_p7, %p1153_p4 }
 0x15e   :  { %v326_v4 = vpop.f32.mrb[0].mxu0 }
 0x15f   :  { %v333_v5 = vmul.f32 %v326_v4, %v1392_v58  ;;  %v328_v6 = vpop.f32.mrb[1].mxu0 }
 0x160   :  { %v330_v8 = vpop.f32.mrb[2].mxu0  ;;  %v334_v9 = vmul.f32 %v328_v6, %v1338_v20 }
 0x161   :  { %v331_v11 = vpop.f32.mrb[3].mxu0  ;;  %v335_v14 = vpack.c.bf16 %v333_v5, %v333_v5 }
 0x162   :  { %v336_v12 = vpack.c.bf16 %v334_v9, %v334_v9 }
 0x164   :  { %573 = vmatprep.mubr.bf16.mxu1 %v336_v12 }
 0x165   :  { %574 = vmatmul.mubr.bf16.vlgmr.msra.gmra.mrb[0].mxu1 %v335_v14 }
 0x166   :  { %918 = vmatpush3.bf16.msra.mxu1 %v1045_v16 }
 0x167   :  { %919 = vmatprep.subr.bf16.mxu1 %v1046_v23 }
 0x16a   :  { %920 = vmatpush3.bf16.msra.mxu1 %v1047_v28 }
 0x16b   :  { %921 = vmatprep.subr.bf16.mxu1 %v1048_v29 }
 0x16e   :  { %922 = vmatpush3.bf16.msra.mxu1 %v1049_v30 }
 0x16f   :  { %923 = vmatprep.subr.bf16.mxu1 %v1050_v31 }
 0x172   :  { %924 = vmatpush3.bf16.msra.mxu1 %v1051_v32 }
 0x173   :  { %925 = vmatprep.subr.bf16.mxu1 %v1052_v33 }
 0x176   :  { %926 = vmatpush3.bf16.msra.mxu1 %v1053_v34 }
 0x177   :  { %927 = vmatprep.subr.bf16.mxu1 %v1054_v35 }
 0x17a   :  { %928 = vmatpush3.bf16.msra.mxu1 %v1055_v36 }
 0x17b   :  { %929 = vmatprep.subr.bf16.mxu1 %v1056_v37 }
 0x17e   :  { %930 = vmatpush3.bf16.msra.mxu1 %v1057_v47 }
 0x17f   :  { %931 = vmatprep.subr.bf16.mxu1 %v1058_v10 }
 0x182   :  { %932 = vmatpush3.bf16.msra.mxu1 %v1059_v13 }
 0x238   :  { %v575_v41 = vpop.f32.mrb[0].mxu1 }
 0x239   :  { %v576_v42 = vadd.f32 %v575_v41, %v374_v39  ;;  %v577_v43 = vpop.f32.mrb[1].mxu1 }
 0x23a   :  { %v578_v44 = vadd.f32 %v577_v43, %v378_v40  ;;  %v579_v45 = vpop.f32.mrb[2].mxu1 }
 0x23b   :  { %v582_v46 = vmax.f32 %v576_v42, 0.0  ;;  %v580_v48 = vpop.f32.mrb[3].mxu1 }
 0x23c   :  { %v583_v49 = vmax.f32 %v578_v44, 0.0 }
 0x23d   :  { %v584_v50 = vmul.f32 %v582_v46, %v1392_v58 }
 0x23e   :  { %v585_v51 = vmul.f32 %v583_v49, %v1338_v20 }
 0x23f   :  { %v586_v53 = vpack.c.bf16 %v584_v50, %v584_v50 }
 0x240   :  { %v587_v52 = vpack.c.bf16 %v585_v51, %v585_v51 }
 0x242   :  { %620 = vmatprep.mubr.bf16.mxu0 %v587_v52 }
 0x243   :  { %621 = vmatmul.mubr.bf16.vlgmr.msra.gmra.mrb[4].mxu0 %v586_v53 }
 0x316   :  { %v622_v54 = vpop.f32.mrb[4].mxu0 }
 0x317   :  { %v629_v55 = vmul.f32 %v622_v54, %v1392_v58  ;;  %v624_v56 = vpop.f32.mrb[5].mxu0 }
 0x318   :  { %v630_v57 = vmul.f32 %v624_v56, %v1338_v20  ;;  %v626_v59 = vpop.f32.mrb[6].mxu0 }
 0x319   :  { %v627_v60 = vpop.f32.mrb[7].mxu0  ;;  %v631_v62 = vpack.c.bf16 %v629_v55, %v629_v55 }
 0x31a   :  { %v632_v61 = vpack.c.bf16 %v630_v57, %v630_v57 }
 0x31c   :  { %800 = vmatprep.mubr.bf16.mxu1 %v632_v61 }
 0x31d   :  { %801 = vmatmul.mubr.bf16.vlgmr.msra.gmra.mrb[4].mxu1 %v631_v62 }
 0x3f0   :  { %v933_v63 = vpop.f32.mrb[4].mxu1 }
 0x3f1   :  { %v934_v7 = vpop.f32.mrb[5].mxu1 }
 0x3f2   :  { %v935_v17 = vadd.f32 %v934_v7, %v933_v63  ;;  %v936_v19 = vpop.f32.mrb[6].mxu1 }
 0x3f3   :  { %v937_v21 = vpop.f32.mrb[7].mxu1 }
 0x3f4   :  { %v803_v22 = vadd.f32 %v935_v17, %v900_v18 }
 0x3f6   :  { %808 = vmax.xlane.f32.xlu0 %v803_v22 }
 0x483   :  { %v809_v58 = vpop.xlane.xlu0 %808 }
 0x484   :  { %v810_v24 = vsub.f32 %v803_v22, %v809_v58 }
 0x486   :  { %v811_v20 = vmul.f32 1.442695, %v810_v24 }
 0x488   :  { %1060 = vpow2.f32 %v811_v20 }
 0x492   :  { %v1061_v25 = vpop.eup %1060 }
 0x493   :  { %813 = vadd.xlane.f32.xlu0 %v1061_v25 }
 0x520   :  { %v814_v26 = vpop.xlane.xlu0 %813 }
 0x521   :  { %1062 = vlog2.f32 %v814_v26 }
 0x52b   :  { %v1063_v27 = vpop.eup %1062 }
 0x52c   :  { %v816_v0 = vmul.f32 0.6931472, %v1063_v27 }
 0x52e   :  { %v817_v1 = vsub.f32 %v810_v24, %v816_v0 }
 0x530   :  { %818 = vst [vmem:[#allocation10] sm:$0xff] %v817_v1 }
 0x531   :  { %1163 = shalt.err (!%p1160_p8)
}
 0x532   :  { %s1164_s10 = scalar_lea.hbm %s1461_s7, 128 }
 0x533   :  { %p1165_p9 = scmp.ne.s32.totalorder %s1461_s7, %s1164_s10  ;;  %p1168_p10 = scmp.lt.u32.totalorder %s1164_s10, %s1461_s7 }
 0x535   :  { %p1170_p11 = pnand %p1168_p10, %p1165_p9 }
 0x537   :  { %1173 = shalt.err (!%p1170_p11)
}
 0x538   :  { %828 = dma.vmem_to_hbm [thread:$0]  %s826_s30, 128, %s1461_s7, [#allocation4]  }
 0x539   :  { %1180 = dma.done.wait [#allocation4], 128  }
 0x53a   :  { %1181 = vsyncadd [#allocation4], 4294967168 }
 0x53b   :  { %832 = vsyncpa [#allocation3], 1 }
 0x53c   :  { %833 = vsyncpa [#allocation6], 1 }
 0x53d   :  { %834 = vsyncpa [#allocation9], 1 }
 0x53e   :  { %835 = vsyncpa [#allocation4], 1 }

</bundles_post_ra>
